<compile_context>
chip_gen: v7x
topology: tpu7x:2x2x1
jax: 0.10.0
libtpu: 0.0.40
codegen_flags: <defaults>
</compile_context>

<pallas_src>
import functools
import math
import numpy as np
import jax
import jax.numpy as jnp
from jax.experimental import pallas as pl
from jax.experimental.pallas import tpu as pltpu

HIDDEN = 32
N_LAYERS = 2
LAP_K = 4
ATOM_IN = 310
ATOM_IN_PAD = 384          # 3*128 lanes; K=384 and K=512 are both 2 K-passes
                           # on 256-deep MXUs, so do NOT pad further.
EDGE_IN = 8
MLP_HID = 512

SIDE_W = 2 * LAP_K + 2     # lap(8) + order flag + const-1 (keep mask folded upstream)
PACK = 4                   # tokens packed per 128-lane group in the tail (4*32=128)
_ROW_ALIGN = 16            # bf16 sublane alignment
_VMEM_LIMIT = 48 * 1024 * 1024


def _round_up(x, m):
    return ((x + m - 1) // m) * m


def _choose_row_tile(n, row_tile, align=_ROW_ALIGN):
    """Largest allowed row tile, but aim for >= 2 grid steps so both v7x
    TensorCores get work on the 'parallel' axis."""
    n_al = _round_up(max(n, 1), align)
    half = _round_up((n_al + 1) // 2, align)
    tr = max(align, min(row_tile, half))
    n_pad = _round_up(n_al, tr)
    return tr, n_pad


def _use_bf16_epilogue():
    """bf16 bias/SiLU epilogue only on chips with bf16 VPU/EUP (v6e, v7x)."""
    try:
        kind = jax.devices()[0].device_kind.lower()
    except Exception:
        return False
    return ("v6" in kind) or ("v7" in kind)


# ----------------------------- Pallas kernels -----------------------------

def _mlp_kernel(x_ref, w1_ref, b1_ref, w2_ref, b2_ref, o_ref, *, epi_dtype):
    # layer 1: [tr, Din](bf16) @ [Din, 512](bf16) with f32 MXU accumulation.
    h = jnp.dot(x_ref[...], w1_ref[...], preferred_element_type=jnp.float32)
    # bias + SiLU epilogue: bf16 on v6e/v7x (EUP/VPU bf16), f32 on v5e.
    h = h.astype(epi_dtype) + b1_ref[...]
    h = h * jax.nn.sigmoid(h)
    h = h.astype(jnp.bfloat16)
    o = jnp.dot(h, w2_ref[...], preferred_element_type=jnp.float32)
    # TODO(synk): Dout=32 < 128 lanes -> masked vst on this store; a
    # (tr/4, 128) lane-packed output needs an in-kernel sublane->lane relayout
    # and is left channels-last for the downstream row gather.
    o_ref[...] = (o + b2_ref[...]).astype(o_ref.dtype)


def mlp_encoder(x, w1, b1, w2, b2, *, epi_dtype, row_tile=2048):
    """Linear -> SiLU -> Linear, gridded over rows, bf16 operands / bf16 out.

    Weights/biases use constant index_maps -> DMA'd once, VMEM-resident.
    """
    n, din = x.shape
    dout = w2.shape[1]
    tr, n_pad = _choose_row_tile(n, row_tile)
    if n_pad != n:
        x = jnp.pad(x, ((0, n_pad - n), (0, 0)))
    xb = x.astype(jnp.bfloat16)
    w1b = w1.astype(jnp.bfloat16)
    w2b = w2.astype(jnp.bfloat16)
    b1r = b1.reshape(1, -1).astype(epi_dtype)
    b2r = b2.reshape(1, -1).astype(jnp.float32)

    cost = pl.CostEstimate(
        flops=int(2 * n_pad * (din * MLP_HID + MLP_HID * dout)),
        transcendentals=int(n_pad * MLP_HID),
        bytes_accessed=int(n_pad * din * 2 + din * MLP_HID * 2
                           + MLP_HID * dout * 2 + (MLP_HID + dout) * 4
                           + n_pad * dout * 2),
    )
    out = pl.pallas_call(
        functools.partial(_mlp_kernel, epi_dtype=epi_dtype),
        out_shape=jax.ShapeDtypeStruct((n_pad, dout), jnp.bfloat16),
        grid=(n_pad // tr,),
        in_specs=[
            pl.BlockSpec((tr, din), lambda i: (i, 0)),          # streamed rows
            pl.BlockSpec((din, MLP_HID), lambda i: (0, 0)),     # resident W1
            pl.BlockSpec((1, MLP_HID), lambda i: (0, 0)),       # resident b1
            pl.BlockSpec((MLP_HID, dout), lambda i: (0, 0)),    # resident W2
            pl.BlockSpec((1, dout), lambda i: (0, 0)),          # resident b2
        ],
        out_specs=pl.BlockSpec((tr, dout), lambda i: (i, 0)),
        compiler_params=pltpu.CompilerParams(
            dimension_semantics=("parallel",),
            vmem_limit_bytes=_VMEM_LIMIT),
        cost_estimate=cost,
    )(xb, w1b, b1r, w2b, b2r)
    return out[:n]


def _tail_kernel(pf_ref, side_ref, w_ref, o_ref):
    # 128-lane dense: pf/out carry 4 tokens per row, side carries 4x10 packed
    # columns, w is the 4-way block-diagonal (40,128) lap+order weight.
    add = jnp.dot(side_ref[...], w_ref[...], preferred_element_type=jnp.float32)
    o_ref[...] = (pf_ref[...].astype(jnp.float32) + add).astype(o_ref.dtype)


def fused_tail(pf_flat, side_flat, w_ext, *, row_tile=2048):
    """out = pf + side @ w_ext, lane-packed 4 tokens per 128 lanes, bf16 I/O.

    pf_flat:   [N, 32]  bf16 (special rows included, zero at padding)
    side_flat: [N, 10]  bf16 (already multiplied by the keep mask)
    w_ext:     [10, 32] f32  (lap_encoder rows, (t1-t0), t0)
    """
    n, d = pf_flat.shape
    sw = side_flat.shape[1]
    tr, g_pad = _choose_row_tile(-(-n // PACK), row_tile)   # packed-row tile
    n_pad = g_pad * PACK
    if n_pad != n:
        pf_flat = jnp.pad(pf_flat, ((0, n_pad - n), (0, 0)))
        side_flat = jnp.pad(side_flat, ((0, n_pad - n), (0, 0)))
    pf_p = pf_flat.reshape(g_pad, PACK * d)                  # [g, 128]  (free reshape)
    side_p = side_flat.reshape(g_pad, PACK * sw)             # [g, 40]
    w_blk = jnp.kron(jnp.eye(PACK, dtype=jnp.float32),
                     w_ext).astype(jnp.bfloat16)             # [40, 128] block-diag

    cost = pl.CostEstimate(
        flops=int(2 * g_pad * (PACK * sw) * (PACK * d) + g_pad * PACK * d),
        transcendentals=0,
        bytes_accessed=int(g_pad * (PACK * d * 2 * 2 + PACK * sw * 2)
                           + PACK * sw * PACK * d * 2),
    )
    out = pl.pallas_call(
        _tail_kernel,
        out_shape=jax.ShapeDtypeStruct((g_pad, PACK * d), jnp.bfloat16),
        grid=(g_pad // tr,),
        in_specs=[
            pl.BlockSpec((tr, PACK * d), lambda i: (i, 0)),
            pl.BlockSpec((tr, PACK * sw), lambda i: (i, 0)),
            pl.BlockSpec((PACK * sw, PACK * d), lambda i: (0, 0)),  # resident W
        ],
        out_specs=pl.BlockSpec((tr, PACK * d), lambda i: (i, 0)),
        input_output_aliases={0: 0},        # reuse the packed pf buffer for out
        compiler_params=pltpu.CompilerParams(
            dimension_semantics=("parallel",),
            vmem_limit_bytes=_VMEM_LIMIT),
        cost_estimate=cost,
    )(pf_p, side_p, w_blk)
    return out.reshape(n_pad, d)[:n]


# ------------------------------- JAX glue ----------------------------------

def build_batch(node_feature, edge_feature, edge_index, node_num, edge_num,
                graph_token, null_token):
    """Static-shape get_batch fused with add_special_tokens.

    Returns padded_index [B,T,2] (tokens only, as the module returns it),
    padded_feature [B,2+T,D] with rows 0/1 = graph/null tokens, the full
    padding mask [B,2+T], the token-only padding mask [B,T], node offsets,
    and max_n.
    """
    B = len(node_num)
    nn_np = np.array(node_num)
    en_np = np.array(edge_num)
    max_len = int((nn_np + en_np).max())
    max_n = int(nn_np.max())
    n_tot = int(nn_np.sum())
    e_tot = int(en_np.sum())
    node_off = np.concatenate([[0], np.cumsum(nn_np)])[:-1]
    edge_off = np.concatenate([[0], np.cumsum(en_np)])[:-1]

    tok = np.arange(max_len)
    node_mask_np = tok[None, :] < nn_np[:, None]                          # [B, T]
    edge_mask_np = (tok[None, :] >= nn_np[:, None]) & \
                   (tok[None, :] < (nn_np + en_np)[:, None])
    pad_mask_np = tok[None, :] >= (nn_np + en_np)[:, None]

    node_src = np.clip(node_off[:, None] + tok[None, :], 0, max(n_tot - 1, 0))
    edge_src = np.clip(edge_off[:, None] + tok[None, :] - nn_np[:, None],
                       0, max(e_tot - 1, 0))                              # empty-edge safe

    node_mask = jnp.asarray(node_mask_np)
    edge_mask = jnp.asarray(edge_mask_np)

    pf_node = jnp.take(node_feature, jnp.asarray(node_src, jnp.int32), axis=0)
    if e_tot > 0:
        pf_edge = jnp.take(edge_feature, jnp.asarray(edge_src, jnp.int32), axis=0)
        tok_feat = (jnp.where(node_mask[..., None], pf_node, 0)
                    + jnp.where(edge_mask[..., None], pf_edge, 0))        # [B, T, D]
    else:
        tok_feat = jnp.where(node_mask[..., None], pf_node, 0)

    # Prepend the two special-token rows so the tail kernel directly writes
    # the final (B, 2+T, D) tensor (no trailing concatenate on its output).
    D = node_feature.shape[-1]
    spec = jnp.concatenate([graph_token, null_token], axis=0).astype(tok_feat.dtype)
    spec = jnp.broadcast_to(spec[None], (B, 2, D))
    padded_feature = jnp.concatenate([spec, tok_feat], axis=1)            # [B, 2+T, D]

    tok_j = jnp.arange(max_len, dtype=jnp.int32)
    node_idx_pair = jnp.broadcast_to(tok_j[None, :, None], (B, max_len, 2))
    if e_tot > 0:
        edge_idx_pair = jnp.take(edge_index.T.astype(jnp.int32),
                                 jnp.asarray(edge_src, jnp.int32), axis=0)
    else:
        edge_idx_pair = jnp.zeros((B, max_len, 2), jnp.int32)
    padded_index = jnp.where(node_mask[..., None], node_idx_pair,
                             jnp.where(edge_mask[..., None], edge_idx_pair, 0))

    padding_mask = np.concatenate([np.zeros((B, 2), dtype=bool), pad_mask_np],
                                  axis=1)
    return (padded_index.astype(jnp.int32), padded_feature,
            jnp.asarray(padding_mask), jnp.asarray(pad_mask_np),
            node_off, max_n)


def get_index_embed(node_id, node_num, node_off, padded_index, max_n):
    """index_embed[b, t] = concat(node_id[b, src], node_id[b, dst]) -> [B, T, 2d]."""
    nn_np = np.array(node_num)
    idx = np.clip(node_off[:, None] + np.arange(max_n)[None, :], 0,
                  max(node_id.shape[0] - 1, 0))
    nm = np.arange(max_n)[None, :] < nn_np[:, None]
    padded_node_id = jnp.where(jnp.asarray(nm)[..., None],
                               jnp.take(node_id, jnp.asarray(idx, jnp.int32),
                                        axis=0), 0.0)                    # [B, max_n, d]
    e0 = jnp.take_along_axis(padded_node_id, padded_index[:, :, 0][..., None], axis=1)
    e1 = jnp.take_along_axis(padded_node_id, padded_index[:, :, 1][..., None], axis=1)
    return jnp.concatenate([e0, e1], axis=-1)                            # [B, T, 2d]


def init_params(key):
    std = 0.02 / math.sqrt(N_LAYERS)
    ks = jax.random.split(key, 8)
    p = {
        "atom_w1": jax.random.normal(ks[0], (ATOM_IN, MLP_HID), jnp.float32) * std,
        "atom_b1": jnp.zeros((MLP_HID,), jnp.float32),
        "atom_w2": jax.random.normal(ks[1], (MLP_HID, HIDDEN), jnp.float32) * std,
        "atom_b2": jnp.zeros((HIDDEN,), jnp.float32),
        "edge_w1": jax.random.normal(ks[2], (EDGE_IN, MLP_HID), jnp.float32) * std,
        "edge_b1": jnp.zeros((MLP_HID,), jnp.float32),
        "edge_w2": jax.random.normal(ks[3], (MLP_HID, HIDDEN), jnp.float32) * std,
        "edge_b2": jnp.zeros((HIDDEN,), jnp.float32),
        "lap_w": jax.random.normal(ks[4], (2 * LAP_K, HIDDEN), jnp.float32) * std,
        "graph_token": jax.random.normal(ks[5], (1, HIDDEN), jnp.float32) * 0.02,
        "null_token": jax.random.normal(ks[6], (1, HIDDEN), jnp.float32) * 0.02,
        "order_table": jax.random.normal(ks[7], (2, HIDDEN), jnp.float32) * 0.02,
    }
    return p


def graph_feature_tokenizer(params, batched_data, use_pallas=True):
    node_data = batched_data["node_data"]
    edge_data = batched_data["edge_data"]
    edge_index = batched_data["edge_index"]
    node_num = batched_data["node_num"]      # python list (static)
    edge_num = batched_data["edge_num"]      # python list (static)
    lap_eigvec = batched_data["lap_eigvec"]

    epi_dtype = jnp.bfloat16 if _use_bf16_epilogue() else jnp.float32

    # Pad atom K dim 310 -> 384 (zero rows/cols: mathematically a no-op).
    node_data_p = jnp.pad(node_data, ((0, 0), (0, ATOM_IN_PAD - ATOM_IN)))
    atom_w1_p = jnp.pad(params["atom_w1"], ((0, ATOM_IN_PAD - ATOM_IN), (0, 0)))

    def mlp_ref(x, w1, b1, w2, b2):
        # mirrors the kernel's bf16-operand / f32-accumulate / bf16-out math
        h = jnp.dot(x.astype(jnp.bfloat16), w1.astype(jnp.bfloat16),
                    preferred_element_type=jnp.float32)
        h = h.astype(epi_dtype) + b1.astype(epi_dtype)
        h = h * jax.nn.sigmoid(h)
        o = jnp.dot(h.astype(jnp.bfloat16), w2.astype(jnp.bfloat16),
                    preferred_element_type=jnp.float32) + b2
        return o.astype(jnp.bfloat16)

    if use_pallas:
        node_feature = mlp_encoder(node_data_p, atom_w1_p, params["atom_b1"],
                                   params["atom_w2"], params["atom_b2"],
                                   epi_dtype=epi_dtype)
        # TODO(synk): fold the edge MLP (Din=8) into the atom pallas_call
        # (shared row grid, both weight sets VMEM-resident) to hide its tiny
        # MXU work under the atom layer-1 passes and drop one launch prologue.
        edge_feature = mlp_encoder(edge_data, params["edge_w1"], params["edge_b1"],
                                   params["edge_w2"], params["edge_b2"],
                                   epi_dtype=epi_dtype)
    else:
        node_feature = mlp_ref(node_data_p, atom_w1_p, params["atom_b1"],
                               params["atom_w2"], params["atom_b2"])
        edge_feature = mlp_ref(edge_data, params["edge_w1"], params["edge_b1"],
                               params["edge_w2"], params["edge_b2"])

    (padded_index, padded_feature, padding_mask, token_pad_mask,
     node_off, max_n) = build_batch(node_feature, edge_feature, edge_index,
                                    node_num, edge_num,
                                    params["graph_token"], params["null_token"])
    B, T2, D = padded_feature.shape
    T = T2 - 2

    # lap node id (pad/truncate eigvec cols to LAP_K); eval -> no sign flip / dropout.
    lap_dim = lap_eigvec.shape[-1]
    if LAP_K > lap_dim:
        eigvec = jnp.pad(lap_eigvec, ((0, 0), (0, LAP_K - lap_dim)))
    else:
        eigvec = lap_eigvec[:, :LAP_K]
    lap_index_embed = get_index_embed(eigvec, node_num, node_off,
                                      padded_index, max_n)               # [B, T, 2K]

    # Side operand (bf16, keep mask folded in): cols 0..7 lap embed,
    # col 8 = (src==dst) order flag, col 9 = const 1 (carries order_table[0]).
    # Padding tokens: pf is already zero from the build_batch masks, and the
    # keep multiply here zeroes their lap/order contribution.
    eq = (padded_index[..., 0] == padded_index[..., 1]).astype(jnp.float32)
    keep = 1.0 - token_pad_mask.astype(jnp.float32)                      # [B, T]
    side_tok = jnp.concatenate(
        [lap_index_embed, eq[..., None], jnp.ones((B, T, 1), jnp.float32)],
        axis=-1) * keep[..., None]                                       # [B, T, 10]
    side = jnp.concatenate(
        [jnp.zeros((B, 2, SIDE_W), jnp.float32), side_tok], axis=1)      # [B, T2, 10]
    side_flat = side.reshape(B * T2, SIDE_W).astype(jnp.bfloat16)

    # Extended weight: rows 0..2K-1 = lap_encoder, row 8 = t1 - t0, row 9 = t0
    # so that side @ w_ext == lap_encoder(lap_embed) + order_encoder(order).
    t0 = params["order_table"][0]
    t1 = params["order_table"][1]
    w_ext = jnp.concatenate(
        [params["lap_w"], (t1 - t0)[None, :], t0[None, :]], axis=0)      # [10, 32]

    pf_flat = padded_feature.reshape(B * T2, D)                          # bf16

    if use_pallas:
        out_flat = fused_tail(pf_flat, side_flat, w_ext)
    else:
        add = jnp.dot(side_flat, w_ext.astype(jnp.bfloat16),
                      preferred_element_type=jnp.float32)
        out_flat = (pf_flat.astype(jnp.float32) + add).astype(jnp.bfloat16)

    padded_feature = out_flat.reshape(B, T2, D)                          # final [B,2+T,D]

    # TODO(synk): rand_node_id / orf_node_id / lap sign-flip / eig-dropout
    # branches are RNG-dependent and disabled in this config; not implemented.
    return padded_feature, padding_mask, padded_index


# --------------------------------- main -------------------------------------

if __name__ == "__main__":
    key = jax.random.PRNGKey(0)
    k1, k2, k3, k4, k5, k6 = jax.random.split(key, 6)

    node_num = [5, 3]
    edge_num = [4, 6]
    n_tot, e_tot = sum(node_num), sum(edge_num)

    node_data = jax.random.normal(k1, (n_tot, ATOM_IN), jnp.float32)
    edge_data = jax.random.normal(k2, (e_tot, EDGE_IN), jnp.float32)
    lap_eigvec = jax.random.normal(k3, (n_tot, max(node_num)), jnp.float32)
    ei0 = jax.random.randint(k4, (2, edge_num[0]), 0, node_num[0])
    ei1 = jax.random.randint(k5, (2, edge_num[1]), 0, node_num[1])
    edge_index = jnp.concatenate([ei0, ei1], axis=1).astype(jnp.int32)

    batched_data = {
        "node_data": node_data,
        "in_degree": jnp.ones((n_tot,), jnp.int32),     # unused in forward
        "out_degree": jnp.ones((n_tot,), jnp.int32),    # unused in forward
        "node_num": node_num,
        "lap_eigvec": lap_eigvec,
        "lap_eigval": jnp.ones((n_tot, max(node_num)), jnp.float32),  # unused
        "edge_index": edge_index,
        "edge_data": edge_data,
        "edge_num": edge_num,
    }

    params = init_params(k6)

    feat, mask, pidx = graph_feature_tokenizer(params, batched_data, use_pallas=True)
    feat = jax.block_until_ready(feat)

    # sanity-check against a pure-JAX reference of the same (bf16) math
    feat_ref, mask_ref, pidx_ref = graph_feature_tokenizer(
        params, batched_data, use_pallas=False)
    np.testing.assert_allclose(np.asarray(feat, dtype=np.float32),
                               np.asarray(feat_ref, dtype=np.float32),
                               rtol=2e-2, atol=2e-3)
    np.testing.assert_array_equal(np.asarray(mask), np.asarray(mask_ref))
    np.testing.assert_array_equal(np.asarray(pidx), np.asarray(pidx_ref))

    B = len(node_num)
    T = max(n + e for n, e in zip(node_num, edge_num))
    assert feat.shape == (B, 2 + T, HIDDEN)
    assert mask.shape == (B, 2 + T)
    assert pidx.shape == (B, T, 2)

    print("KERNEL_OK")
</pallas_src>

<mosaic_0001>
module attributes {stable_mosaic.version = 11 : i64} {
  func.func @_mlp_kernel(%arg0: i32, %arg1: memref<16x384xbf16, #tpu.memory_space<vmem>>, %arg2: memref<384x512xbf16, #tpu.memory_space<vmem>>, %arg3: memref<1x512xf32, #tpu.memory_space<vmem>>, %arg4: memref<512x32xbf16, #tpu.memory_space<vmem>>, %arg5: memref<1x32xf32, #tpu.memory_space<vmem>>, %arg6: memref<16x32xbf16, #tpu.memory_space<vmem>>) attributes {dimension_semantics = [#tpu.dimension_semantics<parallel>], iteration_bounds = array<i64: 1>, scalar_prefetch = 0 : i64, scratch_operands = 0 : i64, tpu.core_type = #tpu.core_type<tc>, window_params = [{transform_indices = @transform_0, window_bounds = array<i64: 16, 384>}, {pipeline_mode = #tpu.pipeline_mode<synchronous>, transform_indices = @transform_1, window_bounds = array<i64: 384, 512>}, {pipeline_mode = #tpu.pipeline_mode<synchronous>, transform_indices = @transform_2, window_bounds = array<i64: 1, 512>}, {pipeline_mode = #tpu.pipeline_mode<synchronous>, transform_indices = @transform_3, window_bounds = array<i64: 512, 32>}, {pipeline_mode = #tpu.pipeline_mode<synchronous>, transform_indices = @transform_4, window_bounds = array<i64: 1, 32>}, {transform_indices = @transform_5, window_bounds = array<i64: 16, 32>}]} {
    %c0 = arith.constant 0 : index
    %c0_0 = arith.constant 0 : index
    %0 = vector.load %arg1[%c0, %c0_0] : memref<16x384xbf16, #tpu.memory_space<vmem>>, vector<16x384xbf16>
    %c0_1 = arith.constant 0 : index
    %c0_2 = arith.constant 0 : index
    %1 = vector.load %arg2[%c0_1, %c0_2] : memref<384x512xbf16, #tpu.memory_space<vmem>>, vector<384x512xbf16>
    %cst = arith.constant dense<0.000000e+00> : vector<16x512xf32>
    %2 = tpu.matmul %0, %1, %cst {dimension_numbers = #tpu.dot_dimension_numbers<[1], [0], [0], [1], [0, 0, 1, 1], [], []>} : vector<16x384xbf16>, vector<384x512xbf16>, vector<16x512xf32> -> vector<16x512xf32>
    %c0_3 = arith.constant 0 : index
    %c0_4 = arith.constant 0 : index
    %3 = vector.load %arg3[%c0_3, %c0_4] : memref<1x512xf32, #tpu.memory_space<vmem>>, vector<1x512xf32>
    %4 = vector.broadcast %3 : vector<1x512xf32> to vector<16x512xf32>
    %5 = arith.addf %2, %4 : vector<16x512xf32>
    %6 = arith.negf %5 : vector<16x512xf32>
    %7 = math.exp %6 : vector<16x512xf32>
    %cst_5 = arith.constant 1.000000e+00 : f32
    %8 = vector.broadcast %cst_5 : f32 to vector<16x512xf32>
    %9 = arith.addf %8, %7 : vector<16x512xf32>
    %10 = arith.divf %8, %9 : vector<16x512xf32>
    %11 = arith.mulf %5, %10 : vector<16x512xf32>
    %12 = arith.truncf %11 : vector<16x512xf32> to vector<16x512xbf16>
    %c0_6 = arith.constant 0 : index
    %c0_7 = arith.constant 0 : index
    %13 = vector.load %arg4[%c0_6, %c0_7] : memref<512x32xbf16, #tpu.memory_space<vmem>>, vector<512x32xbf16>
    %cst_8 = arith.constant dense<0.000000e+00> : vector<16x32xf32>
    %14 = tpu.matmul %12, %13, %cst_8 {dimension_numbers = #tpu.dot_dimension_numbers<[1], [0], [0], [1], [0, 0, 1, 1], [], []>} : vector<16x512xbf16>, vector<512x32xbf16>, vector<16x32xf32> -> vector<16x32xf32>
    %c0_9 = arith.constant 0 : index
    %c0_10 = arith.constant 0 : index
    %15 = vector.load %arg5[%c0_9, %c0_10] : memref<1x32xf32, #tpu.memory_space<vmem>>, vector<1x32xf32>
    %16 = vector.broadcast %15 : vector<1x32xf32> to vector<16x32xf32>
    %17 = arith.addf %14, %16 : vector<16x32xf32>
    %18 = arith.truncf %17 : vector<16x32xf32> to vector<16x32xbf16>
    %c0_11 = arith.constant 0 : index
    %c0_12 = arith.constant 0 : index
    %19 = vector.load %arg6[%c0_11, %c0_12] : memref<16x32xbf16, #tpu.memory_space<vmem>>, vector<16x32xbf16>
    tpu.vector_store %arg6[%c0_11, %c0_12], %18 {strides = array<i32>} : memref<16x32xbf16, #tpu.memory_space<vmem>>, vector<16x32xbf16>,
    return
  }
  func.func @transform_0(%arg0: i32) -> (i32, i32) {
    %c0_i32 = arith.constant 0 : i32
    %c0_i32_0 = arith.constant 0 : i32
    return %arg0, %c0_i32 : i32, i32
  }
  func.func @transform_1(%arg0: i32) -> (i32, i32) {
    %c0_i32 = arith.constant 0 : i32
    %c0_i32_0 = arith.constant 0 : i32
    %c0_i32_1 = arith.constant 0 : i32
    return %c0_i32, %c0_i32_0 : i32, i32
  }
  func.func @transform_2(%arg0: i32) -> (i32, i32) {
    %c0_i32 = arith.constant 0 : i32
    %c0_i32_0 = arith.constant 0 : i32
    %c0_i32_1 = arith.constant 0 : i32
    return %c0_i32, %c0_i32_0 : i32, i32
  }
  func.func @transform_3(%arg0: i32) -> (i32, i32) {
    %c0_i32 = arith.constant 0 : i32
    %c0_i32_0 = arith.constant 0 : i32
    %c0_i32_1 = arith.constant 0 : i32
    return %c0_i32, %c0_i32_0 : i32, i32
  }
  func.func @transform_4(%arg0: i32) -> (i32, i32) {
    %c0_i32 = arith.constant 0 : i32
    %c0_i32_0 = arith.constant 0 : i32
    %c0_i32_1 = arith.constant 0 : i32
    return %c0_i32, %c0_i32_0 : i32, i32
  }
  func.func @transform_5(%arg0: i32) -> (i32, i32) {
    %c0_i32 = arith.constant 0 : i32
    %c0_i32_0 = arith.constant 0 : i32
    return %arg0, %c0_i32 : i32, i32
  }
}

</mosaic_0001>

<bundles_post_ra>
// kernel: tpu_custom_call.1
= control target key start
LH: loop header
LB: loop body
LE: loop exit
PB: predicated region body
PF: predicated region fallthrough
CT: control target
= control target key end

     0   :  { %10 = vsyncpa [#allocation3], 0  ;;  %s1906_s0 = inlined_call_operand.vmem [shape: bf16[16,384], index: 0, kind: input, shape index: {}]   ;;  %s1907_s1 = inlined_call_operand.hbm [shape: bf16[384,512], index: 1, kind: input, shape index: {}]   ;;  %s1908_s2 = inlined_call_operand.vmem [shape: f32[1,512], index: 2, kind: input, shape index: {}]   ;;  %s1909_s3 = inlined_call_operand.vmem [shape: bf16[512,32], index: 3, kind: input, shape index: {}]   ;;  %s1910_s4 = inlined_call_operand.vmem [shape: f32[1,32], index: 4, kind: input, shape index: {}]   ;;  %s1911_s5 = inlined_call_operand.hbm [shape: bf16[16,32], index: 5, kind: output, shape index: {}]  }
   0x1   :  { %11 = vsyncpa [#allocation4], 0  ;;  %s1730_s18 = smov [#allocation2]   ;;  %s1682_s22 = scalar_lea.hbm %s1907_s1, 12288 }
   0x2   :  { %s19_s19 = sshll.u32 %s1730_s18, 4  ;;  %p1683_p0 = scmp.ne.s32.totalorder %s1907_s1, %s1682_s22  ;;  %s20_s19 = int_to_ptr.vmem [resolvable:$true] %s19_s19 }
   0x3   :  { %p1686_p1 = scmp.lt.u32.totalorder %s1682_s22, %s1907_s1 }
   0x5   :  { %p1688_p2 = pnand %p1686_p1, %p1683_p0 }
   0x7   :  { %1691 = shalt.err (!%p1688_p2)
}
   0x8   :  { %s1692_s27 = scalar_lea.vmem %s20_s19, 12288  ;;  %p1697_p4 = scmp.lt.s32.totalorder %s20_s19, %s20_s19 }
   0x9   :  { %p1693_p3 = scmp.ne.s32.totalorder %s20_s19, %s1692_s27  ;;  %p1698_p5 = scmp.lt.s32.totalorder %s1692_s27, %s1692_s27 }
   0xb   :  { %p1699_p6 = por %p1698_p5, %p1697_p4 }
   0xd   :  { %p1700_p7 = pnand %p1699_p6, %p1693_p3 }
   0xf   :  { %1703 = shalt.err (!%p1700_p7)
}
  0x10   :  { %s1731_s28 = smov 256   ;;  %s1732_s29 = smov 16  }
  0x11   :  { %25 = dma.hbm_to_vmem [thread:$0]  %s1907_s1, 12288, %s20_s19, [#allocation3], %s1731_s28, %s1731_s28, %s1732_s29  }
  0x12   :  { %1726 = dma.done.wait [#allocation3], 12288  }
  0x13   :  { %1727 = vsyncadd [#allocation3], 4294955008  ;;  %v1470_v0 = vld [vmem:[#allocation2 + $0x4] ss:$16 sps:$4 sm:$0xff]   ;;  %v1472_v1 = vld [vmem:[#allocation2 + $0xc] ss:$16 sps:$4 sm:$0xff]  }
  0x14   :  { %654 = vmatprep.subr.bf16.mxu0 %v1470_v0  ;;  %v1474_v2 = vld [vmem:[#allocation2] ss:$16 sps:$4 sm:$0xff]   ;;  %v1475_v3 = vld [vmem:[#allocation2 + $0x8] ss:$16 sps:$4 sm:$0xff]   ;;  %740 = vmatprep.subr.bf16.mxu1 %v1472_v1  ;;  %v1476_v4 = vld [vmem:[#allocation2 + $0x24] ss:$16 sps:$4 sm:$0xff]  }
  0x15   :  { %655 = vmatpush1.bf16.msra.mxu0 %v1474_v2  ;;  %741 = vmatpush1.bf16.msra.mxu1 %v1475_v3  ;;  %v1478_v5 = vld [vmem:[#allocation2 + $0x2c] ss:$16 sps:$4 sm:$0xff]   ;;  %v1480_v6 = vld [vmem:[#allocation2 + $0x20] ss:$16 sps:$4 sm:$0xff]   ;;  %v1481_v7 = vld [vmem:[#allocation2 + $0x28] ss:$16 sps:$4 sm:$0xff]  }
  0x16   :  { %656 = vmatprep.subr.bf16.mxu0 %v1476_v4  ;;  %742 = vmatprep.subr.bf16.mxu1 %v1478_v5  ;;  %v1482_v8 = vld [vmem:[#allocation2 + $0x44] ss:$16 sps:$4 sm:$0xff]   ;;  %v1484_v9 = vld [vmem:[#allocation2 + $0x4c] ss:$16 sps:$4 sm:$0xff]   ;;  %v1486_v10 = vld [vmem:[#allocation2 + $0x40] ss:$16 sps:$4 sm:$0xff]  }
  0x17   :  { %v1487_v11 = vld [vmem:[#allocation2 + $0x48] ss:$16 sps:$4 sm:$0xff]   ;;  %v1488_v12 = vld [vmem:[#allocation2 + $0x64] ss:$16 sps:$4 sm:$0xff]   ;;  %v1490_v13 = vld [vmem:[#allocation2 + $0x6c] ss:$16 sps:$4 sm:$0xff]  }
  0x18   :  { %v1492_v14 = vld [vmem:[#allocation2 + $0x60] ss:$16 sps:$4 sm:$0xff]   ;;  %v1493_v15 = vld [vmem:[#allocation2 + $0x68] ss:$16 sps:$4 sm:$0xff]   ;;  %v1494_v16 = vld [vmem:[#allocation2 + $0x84] ss:$16 sps:$4 sm:$0xff]  }
  0x19   :  { %657 = vmatpush1.bf16.msra.mxu0 %v1480_v6  ;;  %743 = vmatpush1.bf16.msra.mxu1 %v1481_v7  ;;  %v1496_v17 = vld [vmem:[#allocation2 + $0x8c] ss:$16 sps:$4 sm:$0xff]   ;;  %v1498_v18 = vld [vmem:[#allocation2 + $0x80] ss:$16 sps:$4 sm:$0xff]   ;;  %v1499_v19 = vld [vmem:[#allocation2 + $0x88] ss:$16 sps:$4 sm:$0xff]  }
  0x1a   :  { %658 = vmatprep.subr.bf16.mxu0 %v1482_v8  ;;  %744 = vmatprep.subr.bf16.mxu1 %v1484_v9  ;;  %v1500_v20 = vld [vmem:[#allocation2 + $0xa4] ss:$16 sps:$4 sm:$0xff]   ;;  %v1502_v21 = vld [vmem:[#allocation2 + $0xac] ss:$16 sps:$4 sm:$0xff]   ;;  %v1504_v22 = vld [vmem:[#allocation2 + $0xa0] ss:$16 sps:$4 sm:$0xff]  }
  0x1b   :  { %v1505_v23 = vld [vmem:[#allocation2 + $0xa8] ss:$16 sps:$4 sm:$0xff]   ;;  %v1506_v24 = vld [vmem:[#allocation2 + $0xc4] ss:$16 sps:$4 sm:$0xff]   ;;  %v1508_v25 = vld [vmem:[#allocation2 + $0xcc] ss:$16 sps:$4 sm:$0xff]  }
  0x1c   :  { %v1510_v26 = vld [vmem:[#allocation2 + $0xc0] ss:$16 sps:$4 sm:$0xff]   ;;  %v1511_v27 = vld [vmem:[#allocation2 + $0xc8] ss:$16 sps:$4 sm:$0xff]   ;;  %v1512_v28 = vld [vmem:[#allocation2 + $0xe4] ss:$16 sps:$4 sm:$0xff]  }
  0x1d   :  { %659 = vmatpush1.bf16.msra.mxu0 %v1486_v10  ;;  %745 = vmatpush1.bf16.msra.mxu1 %v1487_v11  ;;  %v1514_v29 = vld [vmem:[#allocation2 + $0xec] ss:$16 sps:$4 sm:$0xff]   ;;  %v1516_v30 = vld [vmem:[#allocation2 + $0xe0] ss:$16 sps:$4 sm:$0xff]   ;;  %v1517_v31 = vld [vmem:[#allocation2 + $0xe8] ss:$16 sps:$4 sm:$0xff]  }
  0x1e   :  { %660 = vmatprep.subr.bf16.mxu0 %v1488_v12  ;;  %746 = vmatprep.subr.bf16.mxu1 %v1490_v13  ;;  %v1518_v32 = vld [vmem:[#allocation2 + $0x104] ss:$16 sps:$4 sm:$0xff]   ;;  %v1520_v33 = vld [vmem:[#allocation2 + $0x10c] ss:$16 sps:$4 sm:$0xff]   ;;  %v1522_v34 = vld [vmem:[#allocation2 + $0x100] ss:$16 sps:$4 sm:$0xff]  }
  0x1f   :  { %v1523_v35 = vld [vmem:[#allocation2 + $0x108] ss:$16 sps:$4 sm:$0xff]   ;;  %v1524_v36 = vld [vmem:[#allocation2 + $0x124] ss:$16 sps:$4 sm:$0xff]   ;;  %v1526_v37 = vld [vmem:[#allocation2 + $0x12c] ss:$16 sps:$4 sm:$0xff]  }
  0x20   :  { %v1528_v38 = vld [vmem:[#allocation2 + $0x120] ss:$16 sps:$4 sm:$0xff]   ;;  %v1529_v39 = vld [vmem:[#allocation2 + $0x128] ss:$16 sps:$4 sm:$0xff]   ;;  %v1530_v40 = vld [vmem:[#allocation2 + $0x144] ss:$16 sps:$4 sm:$0xff]  }
  0x21   :  { %661 = vmatpush1.bf16.msra.mxu0 %v1492_v14  ;;  %747 = vmatpush1.bf16.msra.mxu1 %v1493_v15  ;;  %v1532_v41 = vld [vmem:[#allocation2 + $0x14c] ss:$16 sps:$4 sm:$0xff]   ;;  %v1534_v42 = vld [vmem:[#allocation2 + $0x140] ss:$16 sps:$4 sm:$0xff]   ;;  %v1535_v43 = vld [vmem:[#allocation2 + $0x148] ss:$16 sps:$4 sm:$0xff]  }
  0x22   :  { %662 = vmatprep.subr.bf16.mxu0 %v1494_v16  ;;  %748 = vmatprep.subr.bf16.mxu1 %v1496_v17  ;;  %v1536_v44 = vld [vmem:[#allocation2 + $0x164] ss:$16 sps:$4 sm:$0xff]   ;;  %v1538_v45 = vld [vmem:[#allocation2 + $0x16c] ss:$16 sps:$4 sm:$0xff]   ;;  %v1540_v46 = vld [vmem:[#allocation2 + $0x160] ss:$16 sps:$4 sm:$0xff]  }
  0x23   :  { %v1541_v47 = vld [vmem:[#allocation2 + $0x168] ss:$16 sps:$4 sm:$0xff]   ;;  %v1568_v48 = vld [vmem:[%s1906_s0 + $0x4] ss:$12 sps:$4 sm:$0xff]   ;;  %v1544_v50 = vld [vmem:[#allocation2 + $0x18c] ss:$16 sps:$4 sm:$0xff]  }
  0x24   :  { %v1542_v49 = vld [vmem:[#allocation2 + $0x184] ss:$16 sps:$4 sm:$0xff]   ;;  %686 = vmatprep.mubr.bf16.mxu0 %v1568_v48  ;;  %772 = vmatprep.mubr.bf16.mxu1 %v1568_v48  ;;  %v1546_v51 = vld [vmem:[#allocation2 + $0x180] ss:$16 sps:$4 sm:$0xff]   ;;  %v1547_v52 = vld [vmem:[#allocation2 + $0x188] ss:$16 sps:$4 sm:$0xff]  }
  0x25   :  { %663 = vmatpush1.bf16.msra.mxu0 %v1498_v18  ;;  %749 = vmatpush1.bf16.msra.mxu1 %v1499_v19  ;;  %v1548_v53 = vld [vmem:[#allocation2 + $0x1a4] ss:$16 sps:$4 sm:$0xff]   ;;  %v1550_v54 = vld [vmem:[#allocation2 + $0x1ac] ss:$16 sps:$4 sm:$0xff]   ;;  %v1552_v55 = vld [vmem:[#allocation2 + $0x1a0] ss:$16 sps:$4 sm:$0xff]  }
  0x26   :  { %664 = vmatprep.subr.bf16.mxu0 %v1500_v20  ;;  %750 = vmatprep.subr.bf16.mxu1 %v1502_v21  ;;  %v1553_v56 = vld [vmem:[#allocation2 + $0x1a8] ss:$16 sps:$4 sm:$0xff]   ;;  %v1554_v57 = vld [vmem:[#allocation2 + $0x1c4] ss:$16 sps:$4 sm:$0xff]   ;;  %v1556_v58 = vld [vmem:[#allocation2 + $0x1cc] ss:$16 sps:$4 sm:$0xff]  }
  0x27   :  { %v1558_v59 = vld [vmem:[#allocation2 + $0x1c0] ss:$16 sps:$4 sm:$0xff]   ;;  %v1559_v60 = vld [vmem:[#allocation2 + $0x1c8] ss:$16 sps:$4 sm:$0xff]   ;;  %v1560_v61 = vld [vmem:[#allocation2 + $0x1e4] ss:$16 sps:$4 sm:$0xff]  }
  0x28   :  { %v1562_v62 = vld [vmem:[#allocation2 + $0x1ec] ss:$16 sps:$4 sm:$0xff]   ;;  %v1564_v63 = vld [vmem:[#allocation2 + $0x1e0] ss:$16 sps:$4 sm:$0xff]   ;;  %v1565_v0 = vld [vmem:[#allocation2 + $0x1e8] ss:$16 sps:$4 sm:$0xff]  }
  0x29   :  { %665 = vmatpush1.bf16.msra.mxu0 %v1504_v22  ;;  %751 = vmatpush1.bf16.msra.mxu1 %v1505_v23  ;;  %v1571_v1 = vld [vmem:[#allocation2 + $0x204] ss:$16 sps:$4 sm:$0xff]   ;;  %v1574_v2 = vld [vmem:[#allocation2 + $0x20c] ss:$16 sps:$4 sm:$0xff]   ;;  %v1569_v4 = vld [vmem:[#allocation2 + $0x200] ss:$16 sps:$4 sm:$0xff]  }
  0x2a   :  { %666 = vmatprep.subr.bf16.mxu0 %v1506_v24  ;;  %752 = vmatprep.subr.bf16.mxu1 %v1508_v25  ;;  %v1566_v3 = vld [vmem:[%s1906_s0] ss:$12 sps:$4 sm:$0xff]   ;;  %v1572_v5 = vld [vmem:[#allocation2 + $0x208] ss:$16 sps:$4 sm:$0xff]   ;;  %v1577_v6 = vld [vmem:[#allocation2 + $0x224] ss:$16 sps:$4 sm:$0xff]  }
  0x2b   :  { %v1580_v7 = vld [vmem:[#allocation2 + $0x22c] ss:$16 sps:$4 sm:$0xff]   ;;  %v1575_v8 = vld [vmem:[#allocation2 + $0x220] ss:$16 sps:$4 sm:$0xff]   ;;  %v1578_v9 = vld [vmem:[#allocation2 + $0x228] ss:$16 sps:$4 sm:$0xff]  }
  0x2c   :  { %v1583_v10 = vld [vmem:[#allocation2 + $0x244] ss:$16 sps:$4 sm:$0xff]   ;;  %v1586_v11 = vld [vmem:[#allocation2 + $0x24c] ss:$16 sps:$4 sm:$0xff]   ;;  %v1581_v12 = vld [vmem:[#allocation2 + $0x240] ss:$16 sps:$4 sm:$0xff]  }
  0x2d   :  { %667 = vmatpush1.bf16.msra.mxu0 %v1510_v26  ;;  %753 = vmatpush1.bf16.msra.mxu1 %v1511_v27  ;;  %v1584_v13 = vld [vmem:[#allocation2 + $0x248] ss:$16 sps:$4 sm:$0xff]   ;;  %v1733_v14 = vmov 0   ;;  %v1589_v15 = vld [vmem:[#allocation2 + $0x264] ss:$16 sps:$4 sm:$0xff]   ;;  %vm1239_vm0 = vcmask 257024  }
  0x2e   :  { %668 = vmatprep.subr.bf16.mxu0 %v1512_v28  ;;  %754 = vmatprep.subr.bf16.mxu1 %v1514_v29  ;;  %v1592_v16 = vld [vmem:[#allocation2 + $0x26c] ss:$16 sps:$4 sm:$0xff]   ;;  %v1587_v17 = vld [vmem:[#allocation2 + $0x260] ss:$16 sps:$4 sm:$0xff]   ;;  %v1590_v18 = vld [vmem:[#allocation2 + $0x268] ss:$16 sps:$4 sm:$0xff]  }
  0x2f   :  { %v1595_v19 = vld [vmem:[#allocation2 + $0x284] ss:$16 sps:$4 sm:$0xff]   ;;  %v1598_v20 = vld [vmem:[#allocation2 + $0x28c] ss:$16 sps:$4 sm:$0xff]   ;;  %v1593_v21 = vld [vmem:[#allocation2 + $0x280] ss:$16 sps:$4 sm:$0xff]  }
  0x30   :  { %v1596_v22 = vld [vmem:[#allocation2 + $0x288] ss:$16 sps:$4 sm:$0xff]   ;;  %v1601_v23 = vld [vmem:[#allocation2 + $0x2a4] ss:$16 sps:$4 sm:$0xff]   ;;  %v1604_v24 = vld [vmem:[#allocation2 + $0x2ac] ss:$16 sps:$4 sm:$0xff]  }
  0x31   :  { %669 = vmatpush1.bf16.msra.mxu0 %v1516_v30  ;;  %755 = vmatpush1.bf16.msra.mxu1 %v1517_v31  ;;  %v1599_v25 = vld [vmem:[#allocation2 + $0x2a0] ss:$16 sps:$4 sm:$0xff]   ;;  %v1602_v26 = vld [vmem:[#allocation2 + $0x2a8] ss:$16 sps:$4 sm:$0xff]   ;;  %v1607_v27 = vld [vmem:[#allocation2 + $0x2c4] ss:$16 sps:$4 sm:$0xff]  }
  0x32   :  { %670 = vmatprep.subr.bf16.mxu0 %v1518_v32  ;;  %756 = vmatprep.subr.bf16.mxu1 %v1520_v33  ;;  %v1610_v28 = vld [vmem:[#allocation2 + $0x2cc] ss:$16 sps:$4 sm:$0xff]   ;;  %v1605_v29 = vld [vmem:[#allocation2 + $0x2c0] ss:$16 sps:$4 sm:$0xff]   ;;  %v1608_v30 = vld [vmem:[#allocation2 + $0x2c8] ss:$16 sps:$4 sm:$0xff]  }
  0x33   :  { %v1613_v31 = vld [vmem:[#allocation2 + $0x2e4] ss:$16 sps:$4 sm:$0xff]   ;;  %v1616_v32 = vld [vmem:[#allocation2 + $0x2ec] ss:$16 sps:$4 sm:$0xff]   ;;  %v1611_v33 = vld [vmem:[#allocation2 + $0x2e0] ss:$16 sps:$4 sm:$0xff]  }
  0x34   :  { %v1630_v48 = vld [vmem:[%s1909_s3 + $0x58] sm:$0xff]   ;;  %s1734_s23 = smov [#allocation5]  }
  0x35   :  { %671 = vmatpush1.bf16.msra.mxu0 %v1522_v34  ;;  %757 = vmatpush1.bf16.msra.mxu1 %v1523_v35  ;;  %v1614_v34 = vld [vmem:[#allocation2 + $0x2e8] ss:$16 sps:$4 sm:$0xff]   ;;  %s1247_s24 = sshll.u32 %s1734_s23, 4  ;;  %s1248_s24 = int_to_ptr.vmem [resolvable:$true] %s1247_s24 }
  0x36   :  { %672 = vmatprep.subr.bf16.mxu0 %v1524_v36  ;;  %758 = vmatprep.subr.bf16.mxu1 %v1526_v37  ;;  %v1617_v35 = vld [vmem:[%s1906_s0 + $0x8] ss:$12 sps:$4 sm:$0xff]   ;;  %v1618_v36 = vld [vmem:[%s1909_s3 + $0x40] sm:$0xff]   ;;  %p1709_p9 = scmp.lt.s32.totalorder %s1248_s24, %s1248_s24 }
  0x37   :  { %v1619_v37 = vld [vmem:[%s1909_s3 + $0xc0] sm:$0xff]  }
  0x39   :  { %673 = vmatpush1.bf16.msra.mxu0 %v1528_v38  ;;  %759 = vmatpush1.bf16.msra.mxu1 %v1529_v39  ;;  %v1620_v38 = vld [vmem:[%s1909_s3] sm:$0xff]  }
  0x3a   :  { %674 = vmatprep.subr.bf16.mxu0 %v1530_v40  ;;  %760 = vmatprep.subr.bf16.mxu1 %v1532_v41  ;;  %v1621_v39 = vld [vmem:[%s1909_s3 + $0x80] sm:$0xff]   ;;  %v1622_v40 = vld [vmem:[%s1909_s3 + $0x48] sm:$0xff]  }
  0x3b   :  { %v1623_v41 = vld [vmem:[%s1909_s3 + $0xc8] sm:$0xff]  }
  0x3d   :  { %675 = vmatpush1.bf16.msra.mxu0 %v1534_v42  ;;  %761 = vmatpush1.bf16.msra.mxu1 %v1535_v43  ;;  %v1624_v42 = vld [vmem:[%s1909_s3 + $0x8] sm:$0xff]  }
  0x3e   :  { %676 = vmatprep.subr.bf16.mxu0 %v1536_v44  ;;  %762 = vmatprep.subr.bf16.mxu1 %v1538_v45  ;;  %v1625_v43 = vld [vmem:[%s1909_s3 + $0x88] sm:$0xff]   ;;  %v1626_v44 = vld [vmem:[%s1909_s3 + $0x50] sm:$0xff]  }
  0x3f   :  { %v1627_v45 = vld [vmem:[%s1909_s3 + $0xd0] sm:$0xff]  }
  0x41   :  { %677 = vmatpush1.bf16.msra.mxu0 %v1540_v46  ;;  %763 = vmatpush1.bf16.msra.mxu1 %v1541_v47  ;;  %v1628_v46 = vld [vmem:[%s1909_s3 + $0x10] sm:$0xff]  }
  0x42   :  { %678 = vmatprep.subr.bf16.mxu0 %v1542_v49  ;;  %764 = vmatprep.subr.bf16.mxu1 %v1544_v50  ;;  %v1629_v47 = vld [vmem:[%s1909_s3 + $0x90] sm:$0xff]   ;;  %v1631_v49 = vld [vmem:[%s1909_s3 + $0xd8] sm:$0xff]  }
  0x43   :  { %v1632_v50 = vld [vmem:[%s1909_s3 + $0x18] sm:$0xff]  }
  0x45   :  { %679 = vmatpush1.bf16.msra.mxu0 %v1546_v51  ;;  %765 = vmatpush1.bf16.msra.mxu1 %v1547_v52  ;;  %v1633_v51 = vld [vmem:[%s1909_s3 + $0x98] sm:$0xff]   ;;  %v1634_v52 = vld [vmem:[%s1909_s3 + $0x60] sm:$0xff]  }
  0x46   :  { %680 = vmatprep.subr.bf16.mxu0 %v1548_v53  ;;  %766 = vmatprep.subr.bf16.mxu1 %v1550_v54  ;;  %v1635_v53 = vld [vmem:[%s1909_s3 + $0xe0] sm:$0xff]  }
  0x47   :  { %v1636_v54 = vld [vmem:[%s1909_s3 + $0x20] sm:$0xff]  }
  0x49   :  { %681 = vmatpush1.bf16.msra.mxu0 %v1552_v55  ;;  %767 = vmatpush1.bf16.msra.mxu1 %v1553_v56  ;;  %v1637_v55 = vld [vmem:[%s1909_s3 + $0xa0] sm:$0xff]   ;;  %v1638_v56 = vld [vmem:[%s1909_s3 + $0x68] sm:$0xff]  }
  0x4a   :  { %682 = vmatprep.subr.bf16.mxu0 %v1554_v57  ;;  %768 = vmatprep.subr.bf16.mxu1 %v1556_v58  ;;  %v1639_v57 = vld [vmem:[%s1909_s3 + $0xe8] sm:$0xff]  }
  0x4b   :  { %v1640_v58 = vld [vmem:[%s1909_s3 + $0x28] sm:$0xff]  }
  0x4d   :  { %683 = vmatpush1.bf16.msra.mxu0 %v1558_v59  ;;  %769 = vmatpush1.bf16.msra.mxu1 %v1559_v60  ;;  %v1641_v59 = vld [vmem:[%s1909_s3 + $0xa8] sm:$0xff]   ;;  %v1642_v60 = vld [vmem:[%s1909_s3 + $0x70] sm:$0xff]  }
  0x4e   :  { %684 = vmatprep.subr.bf16.mxu0 %v1560_v61  ;;  %770 = vmatprep.subr.bf16.mxu1 %v1562_v62  ;;  %v1643_v61 = vld [vmem:[%s1909_s3 + $0xf0] sm:$0xff]  }
  0x4f   :  { %v1644_v62 = vld [vmem:[%s1909_s3 + $0x30] sm:$0xff]  }
  0x51   :  { %685 = vmatpush1.bf16.msra.mxu0 %v1564_v63  ;;  %771 = vmatpush1.bf16.msra.mxu1 %v1565_v0  ;;  %v1645_v63 = vld [vmem:[%s1909_s3 + $0xb0] sm:$0xff]   ;;  %v1646_v0 = vld [vmem:[%s1909_s3 + $0x78] sm:$0xff]  }
  0x52   :  { %697 = vmatprep.subr.bf16.mxu0 %v1571_v1  ;;  %783 = vmatprep.subr.bf16.mxu1 %v1574_v2  ;;  %v1647_v1 = vld [vmem:[%s1909_s3 + $0xf8] sm:$0xff]  }
  0x53   :  { %v1648_v2 = vld [vmem:[%s1909_s3 + $0x38] sm:$0xff]  }
  0x54   :  { %687 = vmatmul.mubr.bf16.vlgmr.msra.gmra.mrb[0].mxu0 %v1566_v3  ;;  %773 = vmatmul.mubr.bf16.vlgmr.msra.gmra.mrb[0].mxu1 %v1566_v3  ;;  %v1649_v3 = vld [vmem:[%s1909_s3 + $0xb8] sm:$0xff]  }
  0x55   :  { %698 = vmatpush1.bf16.msra.mxu0 %v1569_v4  ;;  %784 = vmatpush1.bf16.msra.mxu1 %v1572_v5  ;;  %v138_v4 = vlaneseq }
  0x56   :  { %699 = vmatprep.subr.bf16.mxu0 %v1577_v6  ;;  %785 = vmatprep.subr.bf16.mxu1 %v1580_v7 }
  0x57   :  { %729 = vmatprep.mubr.bf16.mxu0 %v1733_v14  ;;  %815 = vmatprep.mubr.bf16.mxu1 %v1733_v14  ;;  %v139_v5 = vshrl.u32 %v138_v4, 7 }
  0x59   :  { %700 = vmatpush1.bf16.msra.mxu0 %v1575_v8  ;;  %786 = vmatpush1.bf16.msra.mxu1 %v1578_v9  ;;  %v140_v6 = vsub.s32 0, %v139_v5  ;;  %v148_v7 = vsub.s32 2, %v139_v5  ;;  %v136_v8 = vld [vmem:[%s1908_s2] sm:$0xf]  ;;  %v144_v9 = vsub.s32 1, %v139_v5 }
  0x5a   :  { %701 = vmatprep.subr.bf16.mxu0 %v1583_v10  ;;  %787 = vmatprep.subr.bf16.mxu1 %v1586_v11  ;;  %v152_v10 = vsub.s32 3, %v139_v5 }
  0x5b   :  { %v141_v11 = vrot.slane %v136_v8, %v140_v6 }
  0x5c   :  { %v153_v14 = vrot.slane %v136_v8, %v152_v10 }
  0x5d   :  { %702 = vmatpush1.bf16.msra.mxu0 %v1581_v12  ;;  %788 = vmatpush1.bf16.msra.mxu1 %v1584_v13  ;;  %v149_v12 = vrot.slane %v136_v8, %v148_v7  ;;  %v145_v13 = vrot.slane %v136_v8, %v144_v9 }
  0x5e   :  { %703 = vmatprep.subr.bf16.mxu0 %v1589_v15  ;;  %789 = vmatprep.subr.bf16.mxu1 %v1592_v16 }
  0x61   :  { %704 = vmatpush1.bf16.msra.mxu0 %v1587_v17  ;;  %790 = vmatpush1.bf16.msra.mxu1 %v1590_v18 }
  0x62   :  { %705 = vmatprep.subr.bf16.mxu0 %v1595_v19  ;;  %791 = vmatprep.subr.bf16.mxu1 %v1598_v20 }
  0x65   :  { %706 = vmatpush1.bf16.msra.mxu0 %v1593_v21  ;;  %792 = vmatpush1.bf16.msra.mxu1 %v1596_v22 }
  0x66   :  { %707 = vmatprep.subr.bf16.mxu0 %v1601_v23  ;;  %793 = vmatprep.subr.bf16.mxu1 %v1604_v24 }
  0x69   :  { %708 = vmatpush1.bf16.msra.mxu0 %v1599_v25  ;;  %794 = vmatpush1.bf16.msra.mxu1 %v1602_v26 }
  0x6a   :  { %709 = vmatprep.subr.bf16.mxu0 %v1607_v27  ;;  %795 = vmatprep.subr.bf16.mxu1 %v1610_v28 }
  0x6d   :  { %710 = vmatpush1.bf16.msra.mxu0 %v1605_v29  ;;  %796 = vmatpush1.bf16.msra.mxu1 %v1608_v30 }
  0x6e   :  { %711 = vmatprep.subr.bf16.mxu0 %v1613_v31  ;;  %797 = vmatprep.subr.bf16.mxu1 %v1616_v32 }
  0x71   :  { %712 = vmatpush1.bf16.msra.mxu0 %v1611_v33  ;;  %798 = vmatpush1.bf16.msra.mxu1 %v1614_v34 }
  0x72   :  { %1403 = vmatprep.subr.bf16.mxu0 %v1618_v36  ;;  %1425 = vmatprep.subr.bf16.mxu1 %v1619_v37 }
  0x74   :  { %730 = vmatmul.mubr.bf16.vlgmr.msra.gmra.mrb[0].mxu0 %v1617_v35  ;;  %816 = vmatmul.mubr.bf16.vlgmr.msra.gmra.mrb[0].mxu1 %v1617_v35 }
  0x75   :  { %1404 = vmatpush3.bf16.msra.mxu0 %v1620_v38  ;;  %1426 = vmatpush3.bf16.msra.mxu1 %v1621_v39 }
  0x76   :  { %1405 = vmatprep.subr.bf16.mxu0 %v1622_v40  ;;  %1427 = vmatprep.subr.bf16.mxu1 %v1623_v41 }
  0x79   :  { %1406 = vmatpush3.bf16.msra.mxu0 %v1624_v42  ;;  %1428 = vmatpush3.bf16.msra.mxu1 %v1625_v43 }
  0x7a   :  { %1407 = vmatprep.subr.bf16.mxu0 %v1626_v44  ;;  %1429 = vmatprep.subr.bf16.mxu1 %v1627_v45 }
  0x7d   :  { %1408 = vmatpush3.bf16.msra.mxu0 %v1628_v46  ;;  %1430 = vmatpush3.bf16.msra.mxu1 %v1629_v47 }
  0x7e   :  { %1409 = vmatprep.subr.bf16.mxu0 %v1630_v48  ;;  %1431 = vmatprep.subr.bf16.mxu1 %v1631_v49 }
  0x81   :  { %1410 = vmatpush3.bf16.msra.mxu0 %v1632_v50  ;;  %1432 = vmatpush3.bf16.msra.mxu1 %v1633_v51 }
  0x82   :  { %1411 = vmatprep.subr.bf16.mxu0 %v1634_v52  ;;  %1433 = vmatprep.subr.bf16.mxu1 %v1635_v53 }
  0x85   :  { %1412 = vmatpush3.bf16.msra.mxu0 %v1636_v54  ;;  %1434 = vmatpush3.bf16.msra.mxu1 %v1637_v55 }
  0x86   :  { %1413 = vmatprep.subr.bf16.mxu0 %v1638_v56  ;;  %1435 = vmatprep.subr.bf16.mxu1 %v1639_v57 }
  0x89   :  { %1414 = vmatpush3.bf16.msra.mxu0 %v1640_v58  ;;  %1436 = vmatpush3.bf16.msra.mxu1 %v1641_v59 }
  0x8a   :  { %1415 = vmatprep.subr.bf16.mxu0 %v1642_v60  ;;  %1437 = vmatprep.subr.bf16.mxu1 %v1643_v61 }
  0x8d   :  { %1416 = vmatpush3.bf16.msra.mxu0 %v1644_v62  ;;  %1438 = vmatpush3.bf16.msra.mxu1 %v1645_v63 }
  0x8e   :  { %1417 = vmatprep.subr.bf16.mxu0 %v1646_v0  ;;  %1439 = vmatprep.subr.bf16.mxu1 %v1647_v1 }
  0x91   :  { %1418 = vmatpush3.bf16.msra.mxu0 %v1648_v2  ;;  %1440 = vmatpush3.bf16.msra.mxu1 %v1649_v3 }
 0x147   :  { %v731_v15 = vpop.f32.mrb[0].mxu0  ;;  %v817_v16 = vpop.f32.mrb[0].mxu1 }
 0x148   :  { %v1447_v17 = vadd.f32 %v731_v15, %v141_v11  ;;  %v1451_v18 = vadd.f32 %v817_v16, %v149_v12  ;;  %v733_v19 = vpop.f32.mrb[1].mxu0  ;;  %v819_v20 = vpop.f32.mrb[1].mxu1 }
 0x149   :  { %v1448_v21 = vadd.f32 %v733_v19, %v145_v13  ;;  %v1887_v22 = vadd.f32 %v819_v20, %v153_v14  ;;  %v735_v23 = vpop.f32.mrb[2].mxu0  ;;  %v821_v24 = vpop.f32.mrb[2].mxu1 }
 0x14a   :  { %v1358_v25 = vmul.f32 -1.442695, %v1447_v17  ;;  %v1360_v26 = vmul.f32 -1.442695, %v1451_v18  ;;  %v1449_v27 = vadd.f32 %v735_v23, %v141_v11  ;;  %v1453_v28 = vadd.f32 %v821_v24, %v149_v12  ;;  %v737_v29 = vpop.f32.mrb[3].mxu0  ;;  %v823_v30 = vpop.f32.mrb[3].mxu1 }
 0x14b   :  { %v1359_v31 = vmul.f32 -1.442695, %v1448_v21  ;;  %v1361_v32 = vmul.f32 -1.442695, %v1887_v22  ;;  %v1450_v33 = vadd.f32 %v737_v29, %v145_v13  ;;  %v1454_v34 = vadd.f32 %v823_v30, %v153_v14  ;;  %v1366_v13 = vld [vmem:[%s1910_s4] ss:$0 sm:$0xff] }
 0x14c   :  { %1650 = vpow2.f32 %v1358_v25  ;;  %v1362_v35 = vmul.f32 -1.442695, %v1449_v27  ;;  %v1364_v36 = vmul.f32 -1.442695, %v1453_v28  ;;  %s1704_s4 = scalar_lea.vmem %s1248_s24, 128 }
 0x14d   :  { %1652 = vpow2.f32 %v1360_v26  ;;  %v1363_v37 = vmul.f32 -1.442695, %v1450_v33  ;;  %v1365_v38 = vmul.f32 -1.442695, %v1454_v34  ;;  %p1705_p8 = scmp.ne.s32.totalorder %s1248_s24, %s1704_s4  ;;  %p1710_p10 = scmp.lt.s32.totalorder %s1704_s4, %s1704_s4 }
 0x14e   :  { %1654 = vpow2.f32 %v1359_v31 }
 0x14f   :  { %1656 = vpow2.f32 %v1361_v32  ;;  %p1711_p11 = por %p1710_p10, %p1709_p9 }
 0x150   :  { %1658 = vpow2.f32 %v1362_v35 }
 0x151   :  { %1660 = vpow2.f32 %v1364_v36  ;;  %p1712_p12 = pnand %p1711_p11, %p1705_p8 }
 0x152   :  { %1662 = vpow2.f32 %v1363_v37 }
 0x153   :  { %1664 = vpow2.f32 %v1365_v38 }
 0x156   :  { %v1651_v39 = vpop.eup %1650 }
 0x157   :  { %v1653_v40 = vpop.eup %1652  ;;  %v850_v41 = vadd.f32 1.0, %v1651_v39 }
 0x158   :  { %v1655_v42 = vpop.eup %1654  ;;  %v852_v43 = vadd.f32 1.0, %v1653_v40 }
 0x159   :  { %v1657_v44 = vpop.eup %1656  ;;  %1666 = vrcp.f32 %v850_v41  ;;  %v851_v45 = vadd.f32 1.0, %v1655_v42 }
 0x15a   :  { %v1659_v46 = vpop.eup %1658  ;;  %1668 = vrcp.f32 %v852_v43  ;;  %v853_v47 = vadd.f32 1.0, %v1657_v44 }
 0x15b   :  { %v1661_v48 = vpop.eup %1660  ;;  %1670 = vrcp.f32 %v851_v45  ;;  %v854_v49 = vadd.f32 1.0, %v1659_v46 }
 0x15c   :  { %v1663_v50 = vpop.eup %1662  ;;  %1672 = vrcp.f32 %v853_v47  ;;  %v856_v51 = vadd.f32 1.0, %v1661_v48 }
 0x15d   :  { %v1665_v52 = vpop.eup %1664  ;;  %1674 = vrcp.f32 %v854_v49  ;;  %v855_v53 = vadd.f32 1.0, %v1663_v50 }
 0x15e   :  { %1676 = vrcp.f32 %v856_v51  ;;  %v857_v54 = vadd.f32 1.0, %v1665_v52 }
 0x15f   :  { %1678 = vrcp.f32 %v855_v53 }
 0x160   :  { %1680 = vrcp.f32 %v857_v54 }
 0x163   :  { %v1667_v55 = vpop.eup %1666 }
 0x164   :  { %v1669_v56 = vpop.eup %1668  ;;  %v874_v61 = vmul.f32 %v1667_v55, %v1447_v17 }
 0x165   :  { %v1671_v57 = vpop.eup %1670  ;;  %v876_v0 = vmul.f32 %v1669_v56, %v1451_v18 }
 0x166   :  { %v1673_v58 = vpop.eup %1672  ;;  %v875_v3 = vmul.f32 %v1671_v57, %v1448_v21 }
 0x167   :  { %v1675_v59 = vpop.eup %1674  ;;  %v877_v6 = vmul.f32 %v1673_v58, %v1887_v22 }
 0x168   :  { %v1677_v60 = vpop.eup %1676  ;;  %v878_v62 = vmul.f32 %v1675_v59, %v1449_v27 }
 0x169   :  { %v1679_v63 = vpop.eup %1678  ;;  %v880_v1 = vmul.f32 %v1677_v60, %v1453_v28 }
 0x16a   :  { %v1681_v2 = vpop.eup %1680  ;;  %v882_v4 = vpack.c.bf16 %v878_v62, %v874_v61  ;;  %v879_v5 = vmul.f32 %v1679_v63, %v1450_v33 }
 0x16b   :  { %v884_v7 = vpack.c.bf16 %v880_v1, %v876_v0  ;;  %v881_v8 = vmul.f32 %v1681_v2, %v1454_v34 }
 0x16c   :  { %v883_v9 = vpack.c.bf16 %v879_v5, %v875_v3 }
 0x16d   :  { %v885_v10 = vpack.c.bf16 %v881_v8, %v877_v6 }
 0x16e   :  { %1181 = vmatprep.mubr.bf16.mxu0 %v883_v9 }
 0x16f   :  { %1222 = vmatprep.mubr.bf16.mxu1 %v885_v10  ;;  %1182 = vmatmul.mubr.bf16.vlgmr.msra.gmra.mrb[4].mxu0 %v882_v4 }
 0x170   :  { %1223 = vmatmul.mubr.bf16.vlgmr.msra.gmra.mrb[4].mxu1 %v884_v7 }
 0x242   :  { %v1419_v11 = vpop.f32.mrb[4].mxu0 }
 0x243   :  { %v1441_v12 = vpop.f32.mrb[4].mxu1  ;;  %v1420_v14 = vpop.f32.mrb[5].mxu0 }
 0x244   :  { %v1421_v15 = vadd.f32 %v1420_v14, %v1419_v11  ;;  %v1442_v16 = vpop.f32.mrb[5].mxu1  ;;  %v1422_v17 = vpop.f32.mrb[6].mxu0 }
 0x245   :  { %v1443_v18 = vadd.f32 %v1442_v16, %v1441_v12  ;;  %v1444_v19 = vpop.f32.mrb[6].mxu1  ;;  %v1423_v20 = vpop.f32.mrb[7].mxu0 }
 0x246   :  { %v1184_v21 = vadd.f32 %v1421_v15, %v1366_v13  ;;  %v1424_v22 = vadd.f32 %v1423_v20, %v1422_v17  ;;  %v1445_v23 = vpop.f32.mrb[7].mxu1 }
 0x247   :  { %v1446_v24 = vadd.f32 %v1445_v23, %v1444_v19 }
 0x248   :  { %v1225_v25 = vadd.f32 %v1443_v18, %v1184_v21  ;;  %v1187_v26 = vadd.f32 %v1424_v22, %v1366_v13 }
 0x24a   :  { %v1401_v27 = vpack.c.bf16 %v1225_v25, %v1225_v25  ;;  %v1228_v28 = vadd.f32 %v1446_v24, %v1187_v26 }
 0x24c   :  { %1240 = vst.msk [vmem:[#allocation5] sm:$0xf] %vm1239_vm0, %v1401_v27  ;;  %v1402_v29 = vpack.c.bf16 %v1228_v28, %v1228_v28 }
 0x24e   :  { %1241 = vst.msk [vmem:[#allocation5 + $0x4] sm:$0xf] %vm1239_vm0, %v1402_v29 }
 0x24f   :  { %1715 = shalt.err (!%p1712_p12)
}
 0x250   :  { %s1716_s27 = scalar_lea.hbm %s1911_s5, 128 }
 0x251   :  { %p1717_p13 = scmp.ne.s32.totalorder %s1911_s5, %s1716_s27  ;;  %p1720_p0 = scmp.lt.u32.totalorder %s1716_s27, %s1911_s5 }
 0x253   :  { %p1722_p1 = pnand %p1720_p0, %p1717_p13 }
 0x255   :  { %1725 = shalt.err (!%p1722_p1)
}
 0x256   :  { %s1735_s1 = smov 64   ;;  %s1736_s7 = smov 4  }
 0x257   :  { %1253 = dma.vmem_to_hbm [thread:$0]  %s1248_s24, 128, %s1911_s5, [#allocation4], %s1735_s1, %s1735_s1, %s1736_s7  }
 0x258   :  { %1728 = dma.done.wait [#allocation4], 128  }
 0x259   :  { %1729 = vsyncadd [#allocation4], 4294967168 }
 0x25a   :  { %1257 = vsyncpa [#allocation3], 1 }
 0x25b   :  { %1258 = vsyncpa [#allocation4], 1 }

</bundles_post_ra>
